<compile_context>
chip_gen: v6e
topology: v6e:2x2x1
jax: 0.10.0
libtpu: 0.0.40
codegen_flags: <defaults>
</compile_context>

<pallas_src>
import functools

import jax
import jax.numpy as jnp
from jax.experimental import pallas as pl
from jax.experimental.pallas import tpu as pltpu

LANE = 128
SUBLANE = 8
NEG_BIG = -1e30  # prefer a large finite negative over -inf (no inf arithmetic)


def _round_up(x, m):
    return (x + m - 1) // m * m


def _cdiv(a, b):
    return -(-a // b)


def policy_kernel(x_ref, w1_ref, b1_ref, w2_ref, b2_ref, o_ref, *,
                  n_input, n_output):
    # ---- fc1 + relu -------------------------------------------------------
    # The contraction dim (n_input) is tiny (2 for MountainCar), so broadcast
    # multiply-adds on the VPU beat pushing a K=2 matmul through the MXU.
    x = x_ref[...]
    if n_input <= 8:
        h = b1_ref[...]                                   # (1, H) broadcasts
        for k in range(n_input):
            h = h + x[:, k:k + 1] * w1_ref[k:k + 1, :]    # (BM,1)*(1,H)
    else:
        h = jnp.dot(x, w1_ref[...],
                    preferred_element_type=jnp.float32) + b1_ref[...]
    h = jnp.maximum(h, 0.0)

    # ---- fc2 (MXU; lane-dense 128-wide logits) -----------------------------
    # Padded w2 columns are zero and padded b2 columns are -1e30, so the
    # padded logits are -1e30 and exp() of them is exactly 0 -> no explicit
    # iota/where masking needed.
    logits = jnp.dot(h, w2_ref[...],
                     preferred_element_type=jnp.float32) + b2_ref[...]

    # ---- numerically-stable softmax over dim=1 -----------------------------
    m = jnp.max(logits, axis=1, keepdims=True)
    e = jnp.exp(logits - m)
    denom = jnp.sum(e, axis=1, keepdims=True)
    probs = e / denom                                     # exact divide

    # Store only the real class columns (narrow HBM writeback).
    o_ref[...] = probs[:, :n_output].astype(o_ref.dtype)


def _choose_bm(B, block_batch):
    """Pick a batch-tile size that minimizes padding and per-step overhead,
    while keeping an even tile count for large batches (v7x 2-TC balance)."""
    if B <= 512:
        return _round_up(B, SUBLANE)            # single tile
    n_tiles = max(2, _cdiv(B, block_batch))
    if n_tiles % 2:
        n_tiles += 1                            # even -> balanced on 2 TCs
    return _round_up(_cdiv(B, n_tiles), SUBLANE)


def policy_forward(x, w1, b1, w2, b2, *, block_batch=1024):
    """x: (B, n_input) f32.  w1: (n_input, n_hidden), b1: (1, n_hidden),
    w2: (n_hidden, n_output), b2: (1, n_output).  Returns (B, n_output) probs."""
    B, n_input = x.shape
    n_hidden = w1.shape[1]
    n_output = w2.shape[1]

    # Lane-dense logits for the in-kernel matmul/softmax only.
    n_out_pad = _round_up(n_output, LANE)

    bm = _choose_bm(B, block_batch)
    b_pad = _round_up(B, bm)

    x_p = jnp.pad(x, ((0, b_pad - B), (0, 0))) if b_pad != B else x
    w2_p = jnp.pad(w2, ((0, 0), (0, n_out_pad - n_output)))
    b2_p = jnp.pad(b2, ((0, 0), (0, n_out_pad - n_output)),
                   constant_values=NEG_BIG)

    kernel = functools.partial(policy_kernel, n_input=n_input, n_output=n_output)

    out = pl.pallas_call(
        kernel,
        out_shape=jax.ShapeDtypeStruct((b_pad, n_output), jnp.float32),
        grid=(b_pad // bm,),
        in_specs=[
            # x: tiled over the batch grid (double-buffered by Pallas)
            pl.BlockSpec((bm, n_input), lambda i: (i, 0)),
            # weights/biases: constant index_map -> loaded once, VMEM-resident
            pl.BlockSpec((n_input, n_hidden), lambda i: (0, 0)),
            pl.BlockSpec((1, n_hidden), lambda i: (0, 0)),
            pl.BlockSpec((n_hidden, n_out_pad), lambda i: (0, 0)),
            pl.BlockSpec((1, n_out_pad), lambda i: (0, 0)),
        ],
        # Narrow output: block last dim == full array last dim (legal spec).
        out_specs=pl.BlockSpec((bm, n_output), lambda i: (i, 0)),
        compiler_params=pltpu.CompilerParams(
            dimension_semantics=("parallel",)),
    )(x_p, w1, b1, w2_p, b2_p)

    return out[:B] if b_pad != B else out


def init_policy_params(key, n_input, n_hidden, n_output):
    """Deterministic init mimicking nn.Linear default (U[-1/sqrt(fan_in), +])."""
    k1, k2, k3, k4 = jax.random.split(key, 4)
    lim1 = 1.0 / jnp.sqrt(jnp.float32(n_input))
    lim2 = 1.0 / jnp.sqrt(jnp.float32(n_hidden))
    # stored as (in, out) == transposed PyTorch weight
    w1 = jax.random.uniform(k1, (n_input, n_hidden), jnp.float32, -lim1, lim1)
    b1 = jax.random.uniform(k2, (1, n_hidden), jnp.float32, -lim1, lim1)
    w2 = jax.random.uniform(k3, (n_hidden, n_output), jnp.float32, -lim2, lim2)
    b2 = jax.random.uniform(k4, (1, n_output), jnp.float32, -lim2, lim2)
    return w1, b1, w2, b2


def _reference(x, w1, b1, w2, b2):
    h = jnp.maximum(x @ w1 + b1, 0.0)
    return jax.nn.softmax(h @ w2 + b2, axis=1)


if __name__ == "__main__":
    # MountainCar-v0: observation dim = 2, actions = 3; small hidden = 32.
    n_input, n_hidden, n_output = 2, 32, 3

    key = jax.random.PRNGKey(0)
    kx, kp, kb = jax.random.split(key, 3)
    w1, b1, w2, b2 = init_policy_params(kp, n_input, n_hidden, n_output)

    # --- small-shape check (single env step worth of states) ---------------
    batch = 2
    x = jax.random.normal(kx, (batch, n_input), jnp.float32)
    probs = jax.block_until_ready(policy_forward(x, w1, b1, w2, b2))
    ref = _reference(x, w1, b1, w2, b2)
    assert probs.shape == (batch, n_output)
    assert jnp.allclose(probs, ref, atol=1e-5, rtol=1e-5)
    assert jnp.allclose(jnp.sum(probs, axis=1), 1.0, atol=1e-5)

    # --- larger, non-multiple batch to exercise the batch grid + padding ---
    batch_big = 1030
    xb = jax.random.normal(kb, (batch_big, n_input), jnp.float32)
    probs_b = jax.block_until_ready(policy_forward(xb, w1, b1, w2, b2))
    ref_b = _reference(xb, w1, b1, w2, b2)
    assert probs_b.shape == (batch_big, n_output)
    assert jnp.allclose(probs_b, ref_b, atol=1e-5, rtol=1e-5)
    assert jnp.allclose(jnp.sum(probs_b, axis=1), 1.0, atol=1e-5)

    # TODO(synk): action()/Categorical sampling and train_policy() (optimizer
    # step) are host-side RL-loop logic, not kernel work; not translated.
    print("KERNEL_OK")
</pallas_src>

<mosaic_0001>
module attributes {stable_mosaic.version = 11 : i64} {
  func.func @policy_kernel(%arg0: i32, %arg1: memref<8x2xf32, #tpu.memory_space<vmem>>, %arg2: memref<2x32xf32, #tpu.memory_space<vmem>>, %arg3: memref<1x32xf32, #tpu.memory_space<vmem>>, %arg4: memref<32x128xf32, #tpu.memory_space<vmem>>, %arg5: memref<1x128xf32, #tpu.memory_space<vmem>>, %arg6: memref<8x3xf32, #tpu.memory_space<vmem>>) attributes {dimension_semantics = [#tpu.dimension_semantics<parallel>], iteration_bounds = array<i64: 1>, scalar_prefetch = 0 : i64, scratch_operands = 0 : i64, tpu.core_type = #tpu.core_type<tc>, window_params = [{transform_indices = @transform_0, window_bounds = array<i64: 8, 2>}, {pipeline_mode = #tpu.pipeline_mode<synchronous>, transform_indices = @transform_1, window_bounds = array<i64: 2, 32>}, {pipeline_mode = #tpu.pipeline_mode<synchronous>, transform_indices = @transform_2, window_bounds = array<i64: 1, 32>}, {pipeline_mode = #tpu.pipeline_mode<synchronous>, transform_indices = @transform_3, window_bounds = array<i64: 32, 128>}, {pipeline_mode = #tpu.pipeline_mode<synchronous>, transform_indices = @transform_4, window_bounds = array<i64: 1, 128>}, {transform_indices = @transform_5, window_bounds = array<i64: 8, 3>}]} {
    %c0 = arith.constant 0 : index
    %c0_0 = arith.constant 0 : index
    %0 = vector.load %arg1[%c0, %c0_0] : memref<8x2xf32, #tpu.memory_space<vmem>>, vector<8x2xf32>
    %c0_1 = arith.constant 0 : index
    %c0_2 = arith.constant 0 : index
    %1 = vector.load %arg3[%c0_1, %c0_2] : memref<1x32xf32, #tpu.memory_space<vmem>>, vector<1x32xf32>
    %2 = vector.extract_strided_slice %0 {offsets = [0, 0], sizes = [8, 1], strides = [1, 1]} : vector<8x2xf32> to vector<8x1xf32>
    %c0_3 = arith.constant 0 : index
    %c0_4 = arith.constant 0 : index
    %3 = vector.load %arg2[%c0_3, %c0_4] : memref<2x32xf32, #tpu.memory_space<vmem>>, vector<1x32xf32>
    %4 = vector.broadcast %2 : vector<8x1xf32> to vector<8x32xf32>
    %5 = vector.broadcast %3 : vector<1x32xf32> to vector<8x32xf32>
    %6 = arith.mulf %4, %5 : vector<8x32xf32>
    %7 = vector.broadcast %1 : vector<1x32xf32> to vector<8x32xf32>
    %8 = arith.addf %7, %6 : vector<8x32xf32>
    %9 = vector.extract_strided_slice %0 {offsets = [0, 1], sizes = [8, 1], strides = [1, 1]} : vector<8x2xf32> to vector<8x1xf32>
    %c1 = arith.constant 1 : index
    %c0_5 = arith.constant 0 : index
    %10 = vector.load %arg2[%c1, %c0_5] : memref<2x32xf32, #tpu.memory_space<vmem>>, vector<1x32xf32>
    %11 = vector.broadcast %9 : vector<8x1xf32> to vector<8x32xf32>
    %12 = vector.broadcast %10 : vector<1x32xf32> to vector<8x32xf32>
    %13 = arith.mulf %11, %12 : vector<8x32xf32>
    %14 = arith.addf %8, %13 : vector<8x32xf32>
    %cst = arith.constant 0.000000e+00 : f32
    %15 = vector.broadcast %cst : f32 to vector<8x32xf32>
    %16 = arith.maximumf %14, %15 : vector<8x32xf32>
    %c0_6 = arith.constant 0 : index
    %c0_7 = arith.constant 0 : index
    %17 = vector.load %arg4[%c0_6, %c0_7] : memref<32x128xf32, #tpu.memory_space<vmem>>, vector<32x128xf32>
    %cst_8 = arith.constant dense<0.000000e+00> : vector<8x128xf32>
    %18 = tpu.matmul %16, %17, %cst_8 {dimension_numbers = #tpu.dot_dimension_numbers<[1], [0], [0], [1], [0, 0, 1, 1], [], []>} : vector<8x32xf32>, vector<32x128xf32>, vector<8x128xf32> -> vector<8x128xf32>
    %c0_9 = arith.constant 0 : index
    %c0_10 = arith.constant 0 : index
    %19 = vector.load %arg5[%c0_9, %c0_10] : memref<1x128xf32, #tpu.memory_space<vmem>>, vector<1x128xf32>
    %20 = vector.broadcast %19 : vector<1x128xf32> to vector<8x128xf32>
    %21 = arith.addf %18, %20 : vector<8x128xf32>
    %cst_11 = arith.constant dense<0xFF800000> : vector<8xf32>
    %22 = vector.multi_reduction <maximumf>, %21, %cst_11 [1] : vector<8x128xf32> to vector<8xf32>
    %23 = vector.shape_cast %22 : vector<8xf32> to vector<8x1xf32>
    %24 = vector.broadcast %23 : vector<8x1xf32> to vector<8x128xf32>
    %25 = arith.subf %21, %24 : vector<8x128xf32>
    %26 = math.exp %25 : vector<8x128xf32>
    %cst_12 = arith.constant dense<0.000000e+00> : vector<8xf32>
    %27 = vector.multi_reduction <add>, %26, %cst_12 [1] : vector<8x128xf32> to vector<8xf32>
    %28 = vector.shape_cast %27 : vector<8xf32> to vector<8x1xf32>
    %29 = vector.broadcast %28 : vector<8x1xf32> to vector<8x128xf32>
    %30 = arith.divf %26, %29 : vector<8x128xf32>
    %31 = vector.extract_strided_slice %30 {offsets = [0, 0], sizes = [8, 3], strides = [1, 1]} : vector<8x128xf32> to vector<8x3xf32>
    %c0_13 = arith.constant 0 : index
    %c0_14 = arith.constant 0 : index
    %32 = vector.load %arg6[%c0_13, %c0_14] : memref<8x3xf32, #tpu.memory_space<vmem>>, vector<8x3xf32>
    tpu.vector_store %arg6[%c0_13, %c0_14], %31 {strides = array<i32>} : memref<8x3xf32, #tpu.memory_space<vmem>>, vector<8x3xf32>,
    return
  }
  func.func @transform_0(%arg0: i32) -> (i32, i32) {
    %c0_i32 = arith.constant 0 : i32
    %c0_i32_0 = arith.constant 0 : i32
    return %arg0, %c0_i32 : i32, i32
  }
  func.func @transform_1(%arg0: i32) -> (i32, i32) {
    %c0_i32 = arith.constant 0 : i32
    %c0_i32_0 = arith.constant 0 : i32
    %c0_i32_1 = arith.constant 0 : i32
    return %c0_i32, %c0_i32_0 : i32, i32
  }
  func.func @transform_2(%arg0: i32) -> (i32, i32) {
    %c0_i32 = arith.constant 0 : i32
    %c0_i32_0 = arith.constant 0 : i32
    %c0_i32_1 = arith.constant 0 : i32
    return %c0_i32, %c0_i32_0 : i32, i32
  }
  func.func @transform_3(%arg0: i32) -> (i32, i32) {
    %c0_i32 = arith.constant 0 : i32
    %c0_i32_0 = arith.constant 0 : i32
    %c0_i32_1 = arith.constant 0 : i32
    return %c0_i32, %c0_i32_0 : i32, i32
  }
  func.func @transform_4(%arg0: i32) -> (i32, i32) {
    %c0_i32 = arith.constant 0 : i32
    %c0_i32_0 = arith.constant 0 : i32
    %c0_i32_1 = arith.constant 0 : i32
    return %c0_i32, %c0_i32_0 : i32, i32
  }
  func.func @transform_5(%arg0: i32) -> (i32, i32) {
    %c0_i32 = arith.constant 0 : i32
    %c0_i32_0 = arith.constant 0 : i32
    return %arg0, %c0_i32 : i32, i32
  }
}

</mosaic_0001>

<bundles_post_ra>
// kernel: tpu_custom_call.1
= control target key start
LH: loop header
LB: loop body
LE: loop exit
PB: predicated region body
PF: predicated region fallthrough
CT: control target
= control target key end

     0   :  { %10 = vsyncpa [#allocation3], 0  ;;  %s223_s18 = smov [#allocation2]   ;;  %s281_s0 = inlined_call_operand.vmem [shape: f32[8,2], index: 0, kind: input, shape index: {}]   ;;  %s282_s1 = inlined_call_operand.vmem [shape: f32[2,32], index: 1, kind: input, shape index: {}]   ;;  %s283_s2 = inlined_call_operand.vmem [shape: f32[1,32], index: 2, kind: input, shape index: {}]   ;;  %s284_s3 = inlined_call_operand.hbm [shape: f32[32,128], index: 3, kind: input, shape index: {}]   ;;  %s285_s4 = inlined_call_operand.vmem [shape: f32[1,128], index: 4, kind: input, shape index: {}]   ;;  %s286_s5 = inlined_call_operand.vmem [shape: f32[8,3], index: 5, kind: output, shape index: {}]  }
   0x1   :  { %s22_s19 = sshll.u32 %s223_s18, 4  ;;  %s23_s19 = int_to_ptr.vmem [resolvable:$true] %s22_s19 }
   0x2   :  { %s209_s20 = scalar_lea.vmem %s23_s19, 512  ;;  %p214_p1 = scmp.lt.s32.totalorder %s23_s19, %s23_s19 }
   0x3   :  { %p210_p0 = scmp.ne.s32.totalorder %s23_s19, %s209_s20  ;;  %p215_p2 = scmp.lt.s32.totalorder %s209_s20, %s209_s20 }
   0x5   :  { %p216_p3 = por %p215_p2, %p214_p1 }
   0x7   :  { %p217_p4 = pnand %p216_p3, %p210_p0 }
   0x9   :  { %220 = shalt.err (!%p217_p4)
}
   0xa   :  { %s224_s21 = smov 128   ;;  %s225_s22 = smov 8  }
   0xb   :  { %28 = dma.hbm_to_vmem [thread:$0]  %s284_s3, 512, %s23_s19, [#allocation3], %s224_s21, %s224_s21, %s225_s22  }
   0xc   :  { %221 = dma.done.wait [#allocation3], 512  }
   0xd   :  { %222 = vsyncadd [#allocation3], 4294966784  ;;  %v226_v0 = vmov 0   ;;  %v34_v1 = vld [vmem:[%s281_s0] sm:$0xff]  ;;  %v227_v2 = vmov 0.0   ;;  %v69_v3 = vld [vmem:[#allocation2 + $0x18] sm:$0xff] }
   0xe   :  { %195 = vset.pattern.permute.xlu0 %v226_v0  ;;  %177 = vmatprep.subr.mxu0 %v227_v2  ;;  %v68_v4 = vld [vmem:[#allocation2 + $0x10] sm:$0xff]  ;;  %v67_v5 = vld [vmem:[#allocation2 + $0x8] sm:$0xff]  ;;  %v228_v6 = vmov 1   ;;  %v66_v7 = vld [vmem:[#allocation2] sm:$0xff]  ;;  %vm229_vm0 = vmmov 0   ;;  %vm77_vm1 = vcmask 261120  }
   0xf   :  { %39 = vperm.xlu0 %195, %v34_v1   ;;  %178 = vmatpush3.msra.mxu0 %v69_v3  ;;  %v167_v8 = vld [vmem:[%s282_s1] ss:$0 sm:$0xff]  ;;  %v169_v12 = vld [vmem:[%s282_s1 + $0x1] ss:$0 sm:$0xff]  ;;  %vm160_vm2 = vcmask 23552  }
  0x10   :  { %179 = vmatprep.subr.mxu0 %v227_v2  ;;  %185 = vmatprep.mubr.msk.f32.mxu0 %vm229_vm0, %v227_v2  ;;  %v168_v11 = vld [vmem:[%s283_s2] ss:$0 sm:$0xff] }
  0x11   :  { %180 = vmatpush3.msra.mxu0 %v68_v4  ;;  %v170_v18 = vld [vmem:[%s285_s4] ss:$0 sm:$0xff] }
  0x12   :  { %181 = vmatprep.subr.mxu0 %v227_v2 }
  0x13   :  { %196 = vset.pattern.permute.xlu0 %v228_v6  ;;  %182 = vmatpush3.msra.mxu0 %v67_v5 }
  0x14   :  { %56 = vperm.xlu0 %196, %v34_v1   ;;  %183 = vmatprep.subr.mxu0 %v227_v2 }
  0x15   :  { %184 = vmatpush3.msra.mxu0 %v66_v7 }
  0x8a   :  { %v40_v9 = vpop.permute.xlu0 %39 }
  0x8b   :  { %v46_v10 = vmul.f32 %v167_v8, %v40_v9 }
  0x8d   :  { %v53_v14 = vadd.f32 %v168_v11, %v46_v10 }
  0x8f   :  { %v57_v13 = vpop.permute.xlu0 %56 }
  0x90   :  { %v63_v15 = vmul.f32 %v169_v12, %v57_v13 }
  0x92   :  { %v64_v16 = vadd.f32 %v63_v15, %v53_v14 }
  0x94   :  { %v65_v17 = vmax.f32 %v64_v16, 0.0 }
  0x96   :  { %186 = vmatmul.mubr.msk.f32.vlgmr.msra.gmra.mxu0 %vm77_vm1, %v65_v17 }
 0x156   :  { %v147_v19 = vpop.f32.mrf.mxu0 }
 0x157   :  { %v148_v20 = vadd.f32 %v170_v18, %v147_v19 }
 0x158   :  { %v187_v21 = vpop.f32.mrf.mxu0 }
 0x159   :  { %151 = vmax.xlane.f32.xlu1 %v148_v20 }
 0x1e2   :  { %v152_v22 = vpop.xlane.xlu1 %151 }
 0x1e3   :  { %v153_v23 = vsub.f32 %v148_v20, %v152_v22 }
 0x1e5   :  { %v154_v24 = vmul.f32 1.442695, %v153_v23 }
 0x1e7   :  { %197 = vpow2.f32 %v154_v24 }
 0x1f4   :  { %v198_v25 = vpop.eup %197 }
 0x1f5   :  { %156 = vadd.xlane.f32.xlu1 %v198_v25 }
 0x27e   :  { %v157_v26 = vpop.xlane.xlu1 %156 }
 0x27f   :  { %199 = vrcp.f32 %v157_v26 }
 0x28c   :  { %v200_v27 = vpop.eup %199 }
 0x28d   :  { %v159_v28 = vmul.f32 %v200_v27, %v198_v25 }
 0x28f   :  { %161 = vst.msk [vmem:[%s286_s5] sm:$0xff] %vm160_vm2, %v159_v28 }
 0x290   :  { %166 = vsyncpa [#allocation3], 1 }

</bundles_post_ra>
